<compile_context>
chip_gen: v5e
topology: v5e:2x2
jax: 0.10.0
libtpu: 0.0.40
codegen_flags: <defaults>
</compile_context>

<pallas_src>
import functools

import jax
import jax.numpy as jnp
from jax.experimental import pallas as pl
from jax.experimental.pallas import tpu as pltpu


_VMEM_LIMIT = 32 * 1024 * 1024          # safe on v5e/v6e/v7x
_ROW_TILE = 256                         # MXU-friendly M tile
_LANE_DENSE = 512                       # lane width for pure elementwise kernel


def _round_up(n, m):
    return (n + m - 1) // m * m


def _pad_rows(a2, rows_padded):
    pad = rows_padded - a2.shape[0]
    if pad:
        a2 = jnp.pad(a2, ((0, pad), (0, 0)))
    return a2


def _pick_tile(rows, max_tile=_ROW_TILE):
    return min(max_tile, _round_up(rows, 8))


# ----------------------------------------------------------------------------
# In-kernel counter-based PRNG (lowbias32-style hash), pure jnp ops.
# ----------------------------------------------------------------------------
def _hash_uniform(idx_u32, seed_u32):
    x = idx_u32 ^ (seed_u32 * jnp.uint32(0x9E3779B9))
    x = (x ^ (x >> 16)) * jnp.uint32(0x7FEB352D)
    x = (x ^ (x >> 15)) * jnp.uint32(0x846CA68B)
    x = x ^ (x >> 16)
    bits24 = (x >> 8).astype(jnp.int32)          # < 2^24, fits int32
    return bits24.astype(jnp.float32) * jnp.float32(1.0 / (1 << 24))


def _dropout_f32(y, rate, seed_u32, row0, n_cols):
    tm, tn = y.shape
    rows = jax.lax.broadcasted_iota(jnp.int32, (tm, tn), 0) + row0
    cols = jax.lax.broadcasted_iota(jnp.int32, (tm, tn), 1)
    idx = (rows * n_cols + cols).astype(jnp.uint32)
    u = _hash_uniform(idx, seed_u32)
    keep = u >= jnp.float32(rate)
    return jnp.where(keep, y * jnp.float32(1.0 / (1.0 - rate)), jnp.float32(0.0))


# ----------------------------------------------------------------------------
# Kernels
# ----------------------------------------------------------------------------
def _layernorm_kernel(x_ref, g_ref, b_ref, o_ref, *, eps):
    x = x_ref[...].astype(jnp.float32)
    mean = jnp.mean(x, axis=-1, keepdims=True)
    xc = x - mean
    var = jnp.mean(xc * xc, axis=-1, keepdims=True)     # biased var (PyTorch)
    inv = jax.lax.rsqrt(var + eps)                      # EUP
    y = xc * inv * g_ref[...].astype(jnp.float32) + b_ref[...].astype(jnp.float32)
    o_ref[...] = y.astype(o_ref.dtype)


def _linear_kernel(x_ref, w_ref, b_ref, o_ref):
    acc = jnp.dot(x_ref[...], w_ref[...], preferred_element_type=jnp.float32)
    o_ref[...] = (acc + b_ref[...].astype(jnp.float32)).astype(o_ref.dtype)


def _linear_epilogue_kernel(seed_ref, nx_ref, w_ref, b_ref, *rest,
                            rate, residual, n_cols, tm):
    """Matmul + bias with fused dropout (+ residual) epilogue."""
    if residual:
        xres_ref, o_ref = rest
    else:
        (o_ref,) = rest
    y = jnp.dot(nx_ref[...], w_ref[...], preferred_element_type=jnp.float32)
    y = y + b_ref[...].astype(jnp.float32)
    if rate > 0.0:
        y = _dropout_f32(y, rate, seed_ref[0].astype(jnp.uint32),
                         pl.program_id(0) * tm, n_cols)
    if residual:
        y = y + xres_ref[...].astype(jnp.float32)
    o_ref[...] = y.astype(o_ref.dtype)


def _dropout_residual_kernel(seed_ref, x_ref, y_ref, o_ref, *,
                             rate, residual, n_cols, tm):
    y = y_ref[...].astype(jnp.float32)
    if rate > 0.0:
        y = _dropout_f32(y, rate, seed_ref[0].astype(jnp.uint32),
                         pl.program_id(0) * tm, n_cols)
    if residual:
        y = y + x_ref[...].astype(jnp.float32)
    o_ref[...] = y.astype(o_ref.dtype)


# ----------------------------------------------------------------------------
# Pallas wrappers
# ----------------------------------------------------------------------------
def layernorm_pallas(x2, gamma, beta, eps=1e-5):
    R, D = x2.shape
    tm = _pick_tile(R)
    Rp = _round_up(R, tm)
    xp = _pad_rows(x2, Rp)
    out = pl.pallas_call(
        functools.partial(_layernorm_kernel, eps=eps),
        out_shape=jax.ShapeDtypeStruct((Rp, D), x2.dtype),
        grid=(Rp // tm,),
        in_specs=[
            pl.BlockSpec((tm, D), lambda i: (i, 0)),
            pl.BlockSpec((1, D), lambda i: (0, 0)),
            pl.BlockSpec((1, D), lambda i: (0, 0)),
        ],
        out_specs=pl.BlockSpec((tm, D), lambda i: (i, 0)),
        compiler_params=pltpu.CompilerParams(
            dimension_semantics=("parallel",), vmem_limit_bytes=_VMEM_LIMIT),
    )(xp, gamma, beta)
    return out[:R] if Rp != R else out


def linear_pallas(x2, w, b):
    R, D = x2.shape
    Do = w.shape[1]
    tm = _pick_tile(R)
    Rp = _round_up(R, tm)
    xp = _pad_rows(x2, Rp)
    out = pl.pallas_call(
        _linear_kernel,
        out_shape=jax.ShapeDtypeStruct((Rp, Do), x2.dtype),
        grid=(Rp // tm,),
        in_specs=[
            pl.BlockSpec((tm, D), lambda i: (i, 0)),
            pl.BlockSpec((D, Do), lambda i: (0, 0)),   # weight resident
            pl.BlockSpec((1, Do), lambda i: (0, 0)),
        ],
        out_specs=pl.BlockSpec((tm, Do), lambda i: (i, 0)),
        compiler_params=pltpu.CompilerParams(
            dimension_semantics=("parallel",), vmem_limit_bytes=_VMEM_LIMIT),
    )(xp, w, b)
    return out[:R] if Rp != R else out


def linear_dropout_residual_pallas(nx2, w, b, xres2, rate, seed):
    """out = [xres +] dropout(nx @ w + b) in a single pallas_call."""
    assert 0.0 <= rate < 1.0, "dropout rate must be in [0, 1)"
    R, D = nx2.shape
    Do = w.shape[1]
    residual = xres2 is not None
    tm = _pick_tile(R)
    Rp = _round_up(R, tm)
    nxp = _pad_rows(nx2, Rp)
    seed_arr = jnp.asarray([seed], jnp.int32)

    in_specs = [
        pl.BlockSpec((tm, D), lambda i, s: (i, 0)),
        pl.BlockSpec((D, Do), lambda i, s: (0, 0)),    # weight resident
        pl.BlockSpec((1, Do), lambda i, s: (0, 0)),
    ]
    args = [nxp, w, b]
    if residual:
        in_specs.append(pl.BlockSpec((tm, Do), lambda i, s: (i, 0)))
        args.append(_pad_rows(xres2, Rp))

    kern = functools.partial(_linear_epilogue_kernel, rate=float(rate),
                             residual=residual, n_cols=Do, tm=tm)
    out = pl.pallas_call(
        kern,
        out_shape=jax.ShapeDtypeStruct((Rp, Do), nx2.dtype),
        grid_spec=pltpu.PrefetchScalarGridSpec(
            num_scalar_prefetch=1,
            grid=(Rp // tm,),
            in_specs=in_specs,
            out_specs=pl.BlockSpec((tm, Do), lambda i, s: (i, 0)),
        ),
        compiler_params=pltpu.CompilerParams(
            dimension_semantics=("parallel",), vmem_limit_bytes=_VMEM_LIMIT),
    )(seed_arr, *args)
    return out[:R] if Rp != R else out


def dropout_residual_pallas(x, y, rate, seed, residual=True):
    """Generic (unfused sublayer) path: elementwise on a lane-dense view."""
    assert 0.0 <= rate < 1.0, "dropout rate must be in [0, 1)"
    shape = x.shape
    total = x.size
    lane = _LANE_DENSE
    xf, yf = x.reshape(-1), y.reshape(-1)
    pad = (-total) % lane
    if pad:
        xf = jnp.pad(xf, (0, pad))
        yf = jnp.pad(yf, (0, pad))
    rows = xf.size // lane
    x2, y2 = xf.reshape(rows, lane), yf.reshape(rows, lane)
    tm = _pick_tile(rows)
    Rp = _round_up(rows, tm)
    x2, y2 = _pad_rows(x2, Rp), _pad_rows(y2, Rp)
    seed_arr = jnp.asarray([seed], jnp.int32)

    kern = functools.partial(_dropout_residual_kernel, rate=float(rate),
                             residual=bool(residual), n_cols=lane, tm=tm)
    out = pl.pallas_call(
        kern,
        out_shape=jax.ShapeDtypeStruct((Rp, lane), x.dtype),
        grid_spec=pltpu.PrefetchScalarGridSpec(
            num_scalar_prefetch=1,
            grid=(Rp // tm,),
            in_specs=[
                pl.BlockSpec((tm, lane), lambda i, s: (i, 0)),
                pl.BlockSpec((tm, lane), lambda i, s: (i, 0)),
            ],
            out_specs=pl.BlockSpec((tm, lane), lambda i, s: (i, 0)),
        ),
        compiler_params=pltpu.CompilerParams(
            dimension_semantics=("parallel",), vmem_limit_bytes=_VMEM_LIMIT),
    )(seed_arr, x2, y2)
    return out.reshape(-1)[:total].reshape(shape)


# ----------------------------------------------------------------------------
# SublayerConnection in JAX/Pallas
# ----------------------------------------------------------------------------
class SublayerConnectionPallas:
    """Residual connection + (pre-)LayerNorm + dropout, Pallas kernels.

    If the sublayer exposes `fused_forward(nx, A, x_residual, rate, seed)`, the
    dropout + residual (+ bias) are fused into the sublayer's final matmul
    epilogue (single pallas_call); otherwise a generic lane-dense
    dropout+residual kernel is applied to the sublayer output.
    """

    def __init__(self, size, dropout, residual_connection, use_LayerNorm, eps=1e-5):
        assert 0.0 <= dropout < 1.0, "dropout rate must be in [0, 1)"
        self.size = size
        self.dropout_rate = float(dropout)
        self.residual_connection = residual_connection
        self.use_LayerNorm = use_LayerNorm
        self.eps = eps
        if self.use_LayerNorm:
            # nn.LayerNorm(size) default init: gamma = 1, beta = 0
            self.gamma = jnp.ones((1, size), jnp.float32)
            self.beta = jnp.zeros((1, size), jnp.float32)

    def __call__(self, layernum, phaseAct_matrix, x, sublayer, *, dropout_seed=0):
        B, N, T, D = x.shape
        assert D == self.size
        if not self.residual_connection and not self.use_LayerNorm:
            # PyTorch forward falls through every branch and returns None.
            return None

        x2 = x.reshape(-1, D)
        if self.use_LayerNorm:
            nx = layernorm_pallas(x2, self.gamma, self.beta, eps=self.eps).reshape(x.shape)
        else:
            nx = x

        A = phaseAct_matrix if layernum == 2 else None
        xres = x if self.residual_connection else None

        if hasattr(sublayer, "fused_forward"):
            return sublayer.fused_forward(nx, A, xres, self.dropout_rate, dropout_seed)

        y = sublayer(nx) if A is None else sublayer(nx, A)
        return dropout_residual_pallas(x, y, self.dropout_rate, dropout_seed,
                                       residual=self.residual_connection)


class PositionwiseLinearSublayer:
    """Demo sublayer: (optional graph propagation) -> linear d_model->d_model.

    `fused_forward` lets SublayerConnectionPallas fuse bias + dropout +
    residual into this linear's matmul epilogue.
    """

    def __init__(self, W, b):
        self.W = W
        self.b = b

    @staticmethod
    def _propagate(h, A):
        # TODO(synk): graph propagation left as XLA einsum glue (not Pallas).
        return jnp.einsum("nm,bmtd->bntd", A, h)

    def __call__(self, h, A=None):
        if A is not None:
            h = self._propagate(h, A)
        D, Do = self.W.shape
        return linear_pallas(h.reshape(-1, D), self.W, self.b).reshape(
            h.shape[:-1] + (Do,))

    def fused_forward(self, h, A, x_residual, rate, seed):
        if A is not None:
            h = self._propagate(h, A)
        D, Do = self.W.shape
        xres2 = None if x_residual is None else x_residual.reshape(-1, Do)
        out2 = linear_dropout_residual_pallas(
            h.reshape(-1, D), self.W, self.b, xres2, rate, seed)
        return out2.reshape(h.shape[:-1] + (Do,))


# ----------------------------------------------------------------------------
# Demo
# ----------------------------------------------------------------------------
if __name__ == "__main__":
    key = jax.random.PRNGKey(0)
    k_x, k_w, k_a = jax.random.split(key, 3)

    B, N, T, D = 2, 4, 8, 32  # (batch, nodes, time, d_model)
    x = jax.random.normal(k_x, (B, N, T, D), jnp.float32)
    phaseAct = jax.random.uniform(k_a, (N, N), jnp.float32)
    W = jax.random.normal(k_w, (D, D), jnp.float32) * 0.1
    bvec = jnp.full((1, D), 0.05, jnp.float32)

    sublayer = PositionwiseLinearSublayer(W, bvec)

    # --- correctness check at dropout = 0 against a pure-jnp reference ------
    def ref_forward(layernum, A, xx, residual, use_ln, eps=1e-5):
        nx = xx
        if use_ln:
            mu = xx.mean(-1, keepdims=True)
            var = ((xx - mu) ** 2).mean(-1, keepdims=True)
            nx = (xx - mu) * jax.lax.rsqrt(var + eps)
        h = jnp.einsum("nm,bmtd->bntd", A, nx) if layernum == 2 else nx
        y = h @ W + bvec.reshape(-1)
        return xx + y if residual else y

    slc0 = SublayerConnectionPallas(D, 0.0, True, True)
    out_a = slc0(1, phaseAct, x, sublayer, dropout_seed=0)
    out_b = slc0(2, phaseAct, x, sublayer, dropout_seed=0)
    assert jnp.allclose(out_a, ref_forward(1, phaseAct, x, True, True), rtol=1e-3, atol=1e-3)
    assert jnp.allclose(out_b, ref_forward(2, phaseAct, x, True, True), rtol=1e-3, atol=1e-3)

    # --- dropout paths -------------------------------------------------------
    slc = SublayerConnectionPallas(D, 0.1, True, True)
    out1 = slc(1, phaseAct, x, sublayer, dropout_seed=42)   # fused epilogue
    out2 = slc(2, phaseAct, x, sublayer, dropout_seed=43)   # fused, gcn branch

    def plain_sublayer(h, A_=None):                         # generic (unfused) path
        hh = jnp.einsum("nm,bmtd->bntd", A_, h) if A_ is not None else h
        return linear_pallas(hh.reshape(-1, D), W, bvec).reshape(hh.shape)

    out3 = slc(1, phaseAct, x, plain_sublayer, dropout_seed=44)

    slc_no_ln = SublayerConnectionPallas(D, 0.1, True, False)
    out4 = slc_no_ln(1, phaseAct, x, sublayer, dropout_seed=45)

    slc_no_res = SublayerConnectionPallas(D, 0.1, False, True)
    out5 = slc_no_res(1, phaseAct, x, sublayer, dropout_seed=46)

    for o in (out1, out2, out3, out4, out5):
        jax.block_until_ready(o)
        assert o.shape == x.shape and o.dtype == x.dtype
        assert bool(jnp.all(jnp.isfinite(o)))

    print("KERNEL_OK")
</pallas_src>

<mosaic_0001>
module attributes {stable_mosaic.version = 11 : i64} {
  func.func @_layernorm_kernel(%arg0: i32, %arg1: memref<64x32xf32, #tpu.memory_space<vmem>>, %arg2: memref<1x32xf32, #tpu.memory_space<vmem>>, %arg3: memref<1x32xf32, #tpu.memory_space<vmem>>, %arg4: memref<64x32xf32, #tpu.memory_space<vmem>>) attributes {dimension_semantics = [#tpu.dimension_semantics<parallel>], iteration_bounds = array<i64: 1>, scalar_prefetch = 0 : i64, scratch_operands = 0 : i64, tpu.core_type = #tpu.core_type<tc>, window_params = [{transform_indices = @transform_0, window_bounds = array<i64: 64, 32>}, {pipeline_mode = #tpu.pipeline_mode<synchronous>, transform_indices = @transform_1, window_bounds = array<i64: 1, 32>}, {pipeline_mode = #tpu.pipeline_mode<synchronous>, transform_indices = @transform_2, window_bounds = array<i64: 1, 32>}, {transform_indices = @transform_3, window_bounds = array<i64: 64, 32>}]} {
    %c0 = arith.constant 0 : index
    %c0_0 = arith.constant 0 : index
    %0 = vector.load %arg1[%c0, %c0_0] : memref<64x32xf32, #tpu.memory_space<vmem>>, vector<64x32xf32>
    %cst = arith.constant dense<0.000000e+00> : vector<64xf32>
    %1 = vector.multi_reduction <add>, %0, %cst [1] : vector<64x32xf32> to vector<64xf32>
    %2 = vector.shape_cast %1 : vector<64xf32> to vector<64x1xf32>
    %cst_1 = arith.constant 3.200000e+01 : f32
    %3 = vector.broadcast %cst_1 : f32 to vector<64x1xf32>
    %4 = arith.divf %2, %3 : vector<64x1xf32>
    %5 = vector.broadcast %4 : vector<64x1xf32> to vector<64x32xf32>
    %6 = arith.subf %0, %5 : vector<64x32xf32>
    %7 = arith.mulf %6, %6 : vector<64x32xf32>
    %cst_2 = arith.constant dense<0.000000e+00> : vector<64xf32>
    %8 = vector.multi_reduction <add>, %7, %cst_2 [1] : vector<64x32xf32> to vector<64xf32>
    %9 = vector.shape_cast %8 : vector<64xf32> to vector<64x1xf32>
    %cst_3 = arith.constant 3.200000e+01 : f32
    %10 = vector.broadcast %cst_3 : f32 to vector<64x1xf32>
    %11 = arith.divf %9, %10 : vector<64x1xf32>
    %cst_4 = arith.constant 9.99999974E-6 : f32
    %12 = vector.broadcast %cst_4 : f32 to vector<64x1xf32>
    %13 = arith.addf %11, %12 : vector<64x1xf32>
    %14 = math.rsqrt %13 : vector<64x1xf32>
    %15 = vector.broadcast %14 : vector<64x1xf32> to vector<64x32xf32>
    %16 = arith.mulf %6, %15 : vector<64x32xf32>
    %c0_5 = arith.constant 0 : index
    %c0_6 = arith.constant 0 : index
    %17 = vector.load %arg2[%c0_5, %c0_6] : memref<1x32xf32, #tpu.memory_space<vmem>>, vector<1x32xf32>
    %18 = vector.broadcast %17 : vector<1x32xf32> to vector<64x32xf32>
    %19 = arith.mulf %16, %18 : vector<64x32xf32>
    %c0_7 = arith.constant 0 : index
    %c0_8 = arith.constant 0 : index
    %20 = vector.load %arg3[%c0_7, %c0_8] : memref<1x32xf32, #tpu.memory_space<vmem>>, vector<1x32xf32>
    %21 = vector.broadcast %20 : vector<1x32xf32> to vector<64x32xf32>
    %22 = arith.addf %19, %21 : vector<64x32xf32>
    %c0_9 = arith.constant 0 : index
    %c0_10 = arith.constant 0 : index
    %23 = vector.load %arg4[%c0_9, %c0_10] : memref<64x32xf32, #tpu.memory_space<vmem>>, vector<64x32xf32>
    tpu.vector_store %arg4[%c0_9, %c0_10], %22 {strides = array<i32>} : memref<64x32xf32, #tpu.memory_space<vmem>>, vector<64x32xf32>,
    return
  }
  func.func @transform_0(%arg0: i32) -> (i32, i32) {
    %c0_i32 = arith.constant 0 : i32
    %c0_i32_0 = arith.constant 0 : i32
    return %arg0, %c0_i32 : i32, i32
  }
  func.func @transform_1(%arg0: i32) -> (i32, i32) {
    %c0_i32 = arith.constant 0 : i32
    %c0_i32_0 = arith.constant 0 : i32
    %c0_i32_1 = arith.constant 0 : i32
    return %c0_i32, %c0_i32_0 : i32, i32
  }
  func.func @transform_2(%arg0: i32) -> (i32, i32) {
    %c0_i32 = arith.constant 0 : i32
    %c0_i32_0 = arith.constant 0 : i32
    %c0_i32_1 = arith.constant 0 : i32
    return %c0_i32, %c0_i32_0 : i32, i32
  }
  func.func @transform_3(%arg0: i32) -> (i32, i32) {
    %c0_i32 = arith.constant 0 : i32
    %c0_i32_0 = arith.constant 0 : i32
    return %arg0, %c0_i32 : i32, i32
  }
}

</mosaic_0001>

<bundles_post_ra>
// kernel: tpu_custom_call.1
= control target key start
LH: loop header
LB: loop body
LE: loop exit
PB: predicated region body
PF: predicated region fallthrough
CT: control target
= control target key end

     0   :  { %vm22_vm0 = vcmask 261120   ;;  %v263_v16 = vmov 32.0   ;;  %s471_s0 = inlined_call_operand.vmem [shape: f32[64,32], index: 0, kind: input, shape index: {}]   ;;  %s472_s1 = inlined_call_operand.vmem [shape: f32[1,32], index: 1, kind: input, shape index: {}]   ;;  %s473_s2 = inlined_call_operand.vmem [shape: f32[1,32], index: 2, kind: input, shape index: {}]   ;;  %s474_s3 = inlined_call_operand.vmem [shape: f32[64,32], index: 3, kind: output, shape index: {}]  }
   0x1   :  { %v18_v0 = vld [vmem:[%s471_s0 + $0x20] sm:$0xff]  ;;  %v16_v1 = vld [vmem:[%s471_s0 + $0x10] sm:$0xff]  ;;  %v19_v6 = vld [vmem:[%s471_s0 + $0x28] sm:$0xff]  ;;  %245 = vrcp.f32 %v263_v16 }
   0x2   :  { %v14_v2 = vld [vmem:[%s471_s0] sm:$0xff]  ;;  %v35_v3 = vsel %vm22_vm0, %v18_v0, 0.0  ;;  %v29_v4 = vsel %vm22_vm0, %v16_v1, 0.0  ;;  %v17_v7 = vld [vmem:[%s471_s0 + $0x18] sm:$0xff]  ;;  %v15_v8 = vld [vmem:[%s471_s0 + $0x8] sm:$0xff]  ;;  %v38_v9 = vsel %vm22_vm0, %v19_v6, 0.0 }
   0x3   :  { %v23_v5 = vsel %vm22_vm0, %v14_v2, 0.0  ;;  %36 = vadd.xlane.f32.xlu2 %v35_v3  ;;  %30 = vadd.xlane.f32.xlu1 %v29_v4  ;;  %v32_v10 = vsel %vm22_vm0, %v17_v7, 0.0  ;;  %v26_v11 = vsel %vm22_vm0, %v15_v8, 0.0  ;;  %v21_v12 = vld [vmem:[%s471_s0 + $0x38] sm:$0xff]  ;;  %v20_v13 = vld [vmem:[%s471_s0 + $0x30] sm:$0xff] }
   0x4   :  { %24 = vadd.xlane.f32.xlu0 %v23_v5  ;;  %v44_v14 = vsel %vm22_vm0, %v21_v12, 0.0  ;;  %v41_v15 = vsel %vm22_vm0, %v20_v13, 0.0 }
   0x7   :  { %v246_v17 = vpop.eup %245 }
   0x8   :  { %v48_v18 = vmul.f32 32.0, %v246_v17  ;;  %vm52_vm1 = vweird.f32 %v246_v17 }
   0xa   :  { %v49_v19 = vsub.f32 1.0, %v48_v18 }
   0xb   :  { %39 = vadd.xlane.f32.xlu2 %v38_v9  ;;  %33 = vadd.xlane.f32.xlu1 %v32_v10 }
   0xc   :  { %27 = vadd.xlane.f32.xlu0 %v26_v11  ;;  %v50_v20 = vmul.f32 %v246_v17, %v49_v19 }
   0xe   :  { %v51_v21 = vadd.f32 %v246_v17, %v50_v20 }
  0x10   :  { %v316_v22 = vsel %vm52_vm1, %v246_v17, %v51_v21 }
  0x13   :  { %45 = vadd.xlane.f32.xlu1 %v44_v14 }
  0x14   :  { %42 = vadd.xlane.f32.xlu0 %v41_v15 }
  0x76   :  { %v37_v23 = vpop.xlane.xlu2 %36  ;;  %v31_v24 = vpop.xlane.xlu1 %30 }
  0x77   :  { %v56_v25 = vmul.f32 %v316_v22, %v31_v24  ;;  %v25_v26 = vpop.xlane.xlu0 %24  ;;  %v58_v39 = vmul.f32 %v316_v22, %v37_v23 }
  0x78   :  { %v54_v27 = vmul.f32 %v316_v22, %v25_v26 }
  0x79   :  { %v320_v28 = vsub.f32 %v16_v1, %v56_v25  ;;  %v344_v46 = vsub.f32 %v18_v0, %v58_v39 }
  0x7a   :  { %v322_v29 = vsub.f32 %v14_v2, %v54_v27 }
  0x7b   :  { %v72_v30 = vmul.f32 %v320_v28, %v320_v28  ;;  %v74_v55 = vmul.f32 %v344_v46, %v344_v46 }
  0x7c   :  { %v70_v31 = vmul.f32 %v322_v29, %v322_v29 }
  0x7d   :  { %v84_v32 = vsel %vm22_vm0, %v72_v30, 0.0  ;;  %v90_v58 = vsel %vm22_vm0, %v74_v55, 0.0 }
  0x7e   :  { %v40_v33 = vpop.xlane.xlu2 %39  ;;  %85 = vadd.xlane.f32.xlu1 %v84_v32  ;;  %v34_v34 = vpop.xlane.xlu1 %33  ;;  %v78_v35 = vsel %vm22_vm0, %v70_v31, 0.0 }
  0x7f   :  { %v59_v36 = vmul.f32 %v316_v22, %v40_v33  ;;  %v57_v37 = vmul.f32 %v316_v22, %v34_v34  ;;  %79 = vadd.xlane.f32.xlu2 %v78_v35  ;;  %v28_v38 = vpop.xlane.xlu0 %27 }
  0x80   :  { %v55_v40 = vmul.f32 %v316_v22, %v28_v38 }
  0x81   :  { %v334_v41 = vsub.f32 %v19_v6, %v59_v36  ;;  %v336_v42 = vsub.f32 %v17_v7, %v57_v37  ;;  %v384_v37 = vld [vmem:[%s472_s1] ss:$0 sm:$0xff] }
  0x82   :  { %v338_v43 = vsub.f32 %v15_v8, %v55_v40 }
  0x83   :  { %v75_v44 = vmul.f32 %v334_v41, %v334_v41  ;;  %v73_v45 = vmul.f32 %v336_v42, %v336_v42 }
  0x84   :  { %v71_v47 = vmul.f32 %v338_v43, %v338_v43 }
  0x85   :  { %v93_v48 = vsel %vm22_vm0, %v75_v44, 0.0  ;;  %v87_v49 = vsel %vm22_vm0, %v73_v45, 0.0 }
  0x86   :  { %94 = vadd.xlane.f32.xlu1 %v93_v48  ;;  %v81_v50 = vsel %vm22_vm0, %v71_v47, 0.0  ;;  %v46_v51 = vpop.xlane.xlu1 %45  ;;  %v394_v48 = vld [vmem:[%s473_s2] ss:$0 sm:$0xff] }
  0x87   :  { %88 = vadd.xlane.f32.xlu2 %v87_v49  ;;  %82 = vadd.xlane.f32.xlu0 %v81_v50  ;;  %v43_v52 = vpop.xlane.xlu0 %42  ;;  %v61_v54 = vmul.f32 %v316_v22, %v46_v51 }
  0x88   :  { %v60_v53 = vmul.f32 %v316_v22, %v43_v52 }
  0x89   :  { %v357_v57 = vsub.f32 %v21_v12, %v61_v54 }
  0x8a   :  { %v355_v56 = vsub.f32 %v20_v13, %v60_v53 }
  0x8b   :  { %v77_v61 = vmul.f32 %v357_v57, %v357_v57 }
  0x8c   :  { %v76_v59 = vmul.f32 %v355_v56, %v355_v56 }
  0x8d   :  { %v99_v62 = vsel %vm22_vm0, %v77_v61, 0.0 }
  0x8e   :  { %v96_v60 = vsel %vm22_vm0, %v76_v59, 0.0 }
  0x8f   :  { %91 = vadd.xlane.f32.xlu0 %v90_v58  ;;  %97 = vadd.xlane.f32.xlu2 %v96_v60 }
  0x97   :  { %100 = vadd.xlane.f32.xlu0 %v99_v62 }
  0xf1   :  { %v86_v63 = vpop.xlane.xlu1 %85 }
  0xf2   :  { %v104_v0 = vmul.f32 %v86_v63, %v316_v22  ;;  %v80_v1 = vpop.xlane.xlu2 %79 }
  0xf3   :  { %v102_v2 = vmul.f32 %v80_v1, %v316_v22 }
  0xf4   :  { %v112_v3 = vadd.f32 1e-05, %v104_v0 }
  0xf5   :  { %v110_v4 = vadd.f32 1e-05, %v102_v2 }
  0xf6   :  { %247 = vrsqrt.f32 %v112_v3  ;;  %vm144_vm2 = vweird.f32 %v112_v3 }
  0xf7   :  { %249 = vrsqrt.f32 %v110_v4  ;;  %vm124_vm6 = vweird.f32 %v110_v4 }
  0xf9   :  { %v95_v5 = vpop.xlane.xlu1 %94 }
  0xfa   :  { %v107_v6 = vmul.f32 %v95_v5, %v316_v22  ;;  %v89_v7 = vpop.xlane.xlu2 %88  ;;  %v83_v8 = vpop.xlane.xlu0 %82 }
  0xfb   :  { %v105_v9 = vmul.f32 %v89_v7, %v316_v22  ;;  %v103_v10 = vmul.f32 %v83_v8, %v316_v22 }
  0xfc   :  { %v248_v11 = vpop.eup %247  ;;  %v115_v12 = vadd.f32 1e-05, %v107_v6 }
  0xfd   :  { %v250_v13 = vpop.eup %249  ;;  %v139_v14 = vmul.f32 %v248_v11, %v112_v3  ;;  %v371_v15 = vadd.f32 1e-05, %v105_v9  ;;  %v373_v16 = vadd.f32 1e-05, %v103_v10  ;;  %vm145_vm3 = vweird.f32 %v248_v11 }
  0xfe   :  { %v119_v17 = vmul.f32 %v250_v13, %v110_v4  ;;  %251 = vrsqrt.f32 %v115_v12  ;;  %vm125_vm4 = vweird.f32 %v250_v13  ;;  %vm146_vm5 = vmor %vm144_vm2, %vm145_vm3  ;;  %vm174_vm8 = vweird.f32 %v115_v12 }
  0xff   :  { %v140_v18 = vmul.f32 %v248_v11, %v139_v14  ;;  %253 = vrsqrt.f32 %v371_v15  ;;  %vm126_vm7 = vmor %vm124_vm6, %vm125_vm4  ;;  %vm154_vm10 = vweird.f32 %v371_v15  ;;  %vm134_vm15 = vweird.f32 %v373_v16 }
 0x100   :  { %v120_v19 = vmul.f32 %v250_v13, %v119_v17  ;;  %255 = vrsqrt.f32 %v373_v16 }
 0x101   :  { %v141_v20 = vmul.f32 0.5, %v140_v18 }
 0x102   :  { %v121_v21 = vmul.f32 0.5, %v120_v19  ;;  %v98_v23 = vpop.xlane.xlu2 %97  ;;  %v92_v24 = vpop.xlane.xlu0 %91 }
 0x103   :  { %v142_v25 = vsub.f32 1.5, %v141_v20  ;;  %v108_v26 = vmul.f32 %v98_v23, %v316_v22  ;;  %v106_v27 = vmul.f32 %v92_v24, %v316_v22 }
 0x104   :  { %v252_v30 = vpop.eup %251  ;;  %v122_v31 = vsub.f32 1.5, %v121_v21 }
 0x105   :  { %v254_v32 = vpop.eup %253  ;;  %v143_v33 = vmul.f32 %v248_v11, %v142_v25  ;;  %v169_v34 = vmul.f32 %v252_v30, %v115_v12  ;;  %v379_v35 = vadd.f32 1e-05, %v108_v26  ;;  %v388_v40 = vadd.f32 1e-05, %v106_v27 }
 0x106   :  { %v256_v36 = vpop.eup %255  ;;  %v123_v38 = vmul.f32 %v250_v13, %v122_v31  ;;  %v149_v39 = vmul.f32 %v254_v32, %v371_v15  ;;  %vm175_vm9 = vweird.f32 %v252_v30  ;;  %vm155_vm12 = vweird.f32 %v254_v32 }
 0x107   :  { %v147_v44 = vsel %vm146_vm5, %v248_v11, %v143_v33  ;;  %v170_v45 = vmul.f32 %v252_v30, %v169_v34  ;;  %v129_v47 = vmul.f32 %v256_v36, %v373_v16  ;;  %257 = vrsqrt.f32 %v379_v35  ;;  %vm406_vm11 = vmor %vm174_vm8, %vm175_vm9 }
 0x108   :  { %v200_v49 = vmul.f32 %v147_v44, %v320_v28  ;;  %v127_v50 = vsel %vm126_vm7, %v250_v13, %v123_v38  ;;  %v150_v51 = vmul.f32 %v254_v32, %v149_v39  ;;  %259 = vrsqrt.f32 %v388_v40  ;;  %vm156_vm14 = vmor %vm154_vm10, %vm155_vm12 }
 0x109   :  { %v198_v52 = vmul.f32 %v127_v50, %v322_v29  ;;  %v171_v53 = vmul.f32 0.5, %v170_v45  ;;  %v130_v54 = vmul.f32 %v256_v36, %v129_v47  ;;  %vm135_vm13 = vweird.f32 %v256_v36 }
 0x10a   :  { %v212_v55 = vmul.f32 %v384_v37, %v200_v49  ;;  %v151_v58 = vmul.f32 0.5, %v150_v51  ;;  %v101_v59 = vpop.xlane.xlu0 %100  ;;  %vm136_vm1 = vmor %vm134_vm15, %vm135_vm13  ;;  %vm184_vm2 = vweird.f32 %v379_v35  ;;  %vm164_vm6 = vweird.f32 %v388_v40 }
 0x10b   :  { %v210_v60 = vmul.f32 %v384_v37, %v198_v52  ;;  %v172_v28 = vsub.f32 1.5, %v171_v53  ;;  %v131_v61 = vmul.f32 0.5, %v130_v54  ;;  %v109_v62 = vmul.f32 %v101_v59, %v316_v22 }
 0x10c   :  { %v224_v63 = vadd.f32 %v394_v48, %v212_v55  ;;  %v152_v0 = vsub.f32 1.5, %v151_v58 }
 0x10d   :  { %v222_v1 = vadd.f32 %v394_v48, %v210_v60  ;;  %v173_v2 = vmul.f32 %v252_v30, %v172_v28  ;;  %v132_v3 = vsub.f32 1.5, %v131_v61  ;;  %v117_v4 = vadd.f32 1e-05, %v109_v62  ;;  %v258_v5 = vpop.eup %257 }
 0x10e   :  { %232 = vst.msk [vmem:[%s474_s3 + $0x10] sm:$0xff] %vm22_vm0, %v224_v63  ;;  %v153_v22 = vmul.f32 %v254_v32, %v152_v0  ;;  %v179_v8 = vmul.f32 %v258_v5, %v379_v35  ;;  %v260_v9 = vpop.eup %259  ;;  %vm185_vm3 = vweird.f32 %v258_v5 }
 0x10f   :  { %230 = vst.msk [vmem:[%s474_s3] sm:$0xff] %vm22_vm0, %v222_v1  ;;  %v177_v6 = vsel %vm406_vm11, %v252_v30, %v173_v2  ;;  %v133_v7 = vmul.f32 %v256_v36, %v132_v3  ;;  %261 = vrsqrt.f32 %v117_v4  ;;  %v159_v17 = vmul.f32 %v260_v9, %v388_v40  ;;  %vm186_vm5 = vmor %vm184_vm2, %vm185_vm3 }
 0x110   :  { %v203_v10 = vmul.f32 %v177_v6, %v334_v41  ;;  %v157_v11 = vsel %vm156_vm14, %v254_v32, %v153_v22  ;;  %v180_v14 = vmul.f32 %v258_v5, %v179_v8  ;;  %vm165_vm4 = vweird.f32 %v260_v9 }
 0x111   :  { %v201_v12 = vmul.f32 %v157_v11, %v336_v42  ;;  %v137_v13 = vsel %vm136_vm1, %v256_v36, %v133_v7  ;;  %v160_v20 = vmul.f32 %v260_v9, %v159_v17  ;;  %vm166_vm7 = vmor %vm164_vm6, %vm165_vm4  ;;  %vm194_vm9 = vweird.f32 %v117_v4 }
 0x112   :  { %v215_v15 = vmul.f32 %v384_v37, %v203_v10  ;;  %v199_v18 = vmul.f32 %v137_v13, %v338_v43  ;;  %v181_v19 = vmul.f32 0.5, %v180_v14 }
 0x113   :  { %v213_v16 = vmul.f32 %v384_v37, %v201_v12  ;;  %v161_v24 = vmul.f32 0.5, %v160_v20 }
 0x114   :  { %v227_v41 = vadd.f32 %v394_v48, %v215_v15  ;;  %v211_v21 = vmul.f32 %v384_v37, %v199_v18  ;;  %v182_v23 = vsub.f32 1.5, %v181_v19 }
 0x115   :  { %v225_v42 = vadd.f32 %v394_v48, %v213_v16  ;;  %v262_v25 = vpop.eup %261  ;;  %v162_v27 = vsub.f32 1.5, %v161_v24 }
 0x116   :  { %235 = vst.msk [vmem:[%s474_s3 + $0x28] sm:$0xff] %vm22_vm0, %v227_v41  ;;  %v223_v43 = vadd.f32 %v394_v48, %v211_v21  ;;  %v183_v26 = vmul.f32 %v258_v5, %v182_v23  ;;  %v189_v30 = vmul.f32 %v262_v25, %v117_v4  ;;  %vm195_vm8 = vweird.f32 %v262_v25 }
 0x117   :  { %233 = vst.msk [vmem:[%s474_s3 + $0x18] sm:$0xff] %vm22_vm0, %v225_v42  ;;  %v163_v32 = vmul.f32 %v260_v9, %v162_v27  ;;  %vm196_vm10 = vmor %vm194_vm9, %vm195_vm8 }
 0x118   :  { %231 = vst.msk [vmem:[%s474_s3 + $0x8] sm:$0xff] %vm22_vm0, %v223_v43  ;;  %v187_v31 = vsel %vm186_vm5, %v258_v5, %v183_v26  ;;  %v190_v33 = vmul.f32 %v262_v25, %v189_v30 }
 0x119   :  { %v204_v34 = vmul.f32 %v187_v31, %v355_v56  ;;  %v167_v35 = vsel %vm166_vm7, %v260_v9, %v163_v32 }
 0x11a   :  { %v191_v36 = vmul.f32 0.5, %v190_v33  ;;  %v202_v39 = vmul.f32 %v167_v35, %v344_v46 }
 0x11b   :  { %v216_v38 = vmul.f32 %v384_v37, %v204_v34 }
 0x11c   :  { %v192_v44 = vsub.f32 1.5, %v191_v36  ;;  %v214_v47 = vmul.f32 %v384_v37, %v202_v39 }
 0x11d   :  { %v228_v45 = vadd.f32 %v394_v48, %v216_v38 }
 0x11e   :  { %v193_v49 = vmul.f32 %v262_v25, %v192_v44  ;;  %v226_v56 = vadd.f32 %v394_v48, %v214_v47 }
 0x11f   :  { %236 = vst.msk [vmem:[%s474_s3 + $0x30] sm:$0xff] %vm22_vm0, %v228_v45 }
 0x120   :  { %v197_v40 = vsel %vm196_vm10, %v262_v25, %v193_v49  ;;  %234 = vst.msk [vmem:[%s474_s3 + $0x20] sm:$0xff] %vm22_vm0, %v226_v56 }
 0x121   :  { %v205_v46 = vmul.f32 %v197_v40, %v357_v57 }
 0x123   :  { %v217_v50 = vmul.f32 %v384_v37, %v205_v46 }
 0x125   :  { %v229_v51 = vadd.f32 %v394_v48, %v217_v50 }
 0x127   :  { %237 = vst.msk [vmem:[%s474_s3 + $0x38] sm:$0xff] %vm22_vm0, %v229_v51 }

</bundles_post_ra>
